<compile_context>
chip_gen: v5e
topology: v5e:2x2
jax: 0.10.0
libtpu: 0.0.40
codegen_flags: <defaults>
</compile_context>

<pallas_src>
import functools

import jax
import jax.numpy as jnp
from jax import lax
from jax.experimental import pallas as pl
from jax.experimental.pallas import tpu as pltpu


def _round_up(x, m):
    return ((x + m - 1) // m) * m


def _pick_tile(n, pref):
    """Tile for a dimension of extent n: full extent if small, else `pref`."""
    return n if n <= pref else pref


# --------------------------------------------------------------------------
# Shared in-kernel math
# --------------------------------------------------------------------------
def _mlp_forward(x, w1, b1, w2, b2, w3, b3, *, compute_dtype, precision):
    """Linear/ReLU/Linear/ReLU/Linear on a row tile; f32 accumulation."""
    def mm(a, w):
        return jnp.dot(a.astype(compute_dtype), w,
                       preferred_element_type=jnp.float32, precision=precision)
    h = jnp.maximum(mm(x, w1) + b1, 0.0)       # bias-add / ReLU stay f32
    h = jnp.maximum(mm(h, w2) + b2, 0.0)
    return mm(h, w3) + b3                      # f32 (tm, op)


def _gram(a, b, precision):
    # Contract the LAST dims of both operands (a @ b.T without an XLU transpose).
    return lax.dot_general(a, b, dimension_numbers=(((1,), (1,)), ((), ())),
                           preferred_element_type=jnp.float32,
                           precision=precision)


# --------------------------------------------------------------------------
# Kernels
# --------------------------------------------------------------------------
def _mlp_kernel(x_ref, w1_ref, b1_ref, w2_ref, b2_ref, w3_ref, b3_ref, z_ref,
                *, compute_dtype, precision):
    z = _mlp_forward(x_ref[...], w1_ref[...], b1_ref[...], w2_ref[...],
                     b2_ref[...], w3_ref[...], b3_ref[...],
                     compute_dtype=compute_dtype, precision=precision)
    z_ref[...] = z.astype(z_ref.dtype)


def _fused_kernel(x1_ref, w1_ref, b1_ref, w2_ref, b2_ref, w3_ref, b3_ref,
                  z2_ref, out_ref, *, compute_dtype, precision):
    # MLP(x1 row tile) + Gram against resident z2, z1 never written to HBM.
    z1 = _mlp_forward(x1_ref[...], w1_ref[...], b1_ref[...], w2_ref[...],
                      b2_ref[...], w3_ref[...], b3_ref[...],
                      compute_dtype=compute_dtype, precision=precision)
    out_ref[...] = _gram(z1.astype(compute_dtype), z2_ref[...],
                         precision).astype(out_ref.dtype)


def _gram_kernel(z1_ref, z2_ref, out_ref, *, precision):
    # z1/z2 arrive already in the matmul operand dtype (bf16 when enabled).
    out_ref[...] = _gram(z1_ref[...], z2_ref[...], precision).astype(out_ref.dtype)


# --------------------------------------------------------------------------
# Wrapper
# --------------------------------------------------------------------------
def nn_kernel(x1, x2, params, diag=False, use_bf16=True,
              row_tile=256, gram_tile_n=512,
              fuse_vmem_budget=8 * 1024 * 1024, force_two_stage=False):
    """out = MLP(x1) @ MLP(x2).T   (or its diagonal if diag=True)."""
    w1, b1, w2, b2, w3, b3 = params
    n1, d = x1.shape
    n2, d2 = x2.shape
    assert d == d2
    hidden = w1.shape[1]
    out_dim = w3.shape[1]

    f32 = jnp.float32
    compute_dtype = jnp.bfloat16 if use_bf16 else f32
    # f32 path uses HIGHEST so it matches a HIGHEST-precision reference to
    # ~1e-6; bf16 path uses default single-pass MXU.
    precision = None if use_bf16 else lax.Precision.HIGHEST
    z_dtype = compute_dtype                 # stage-1 embedding storage dtype
    ew = jnp.dtype(compute_dtype).itemsize  # matmul-operand element size
    ez = jnp.dtype(z_dtype).itemsize
    hp = _round_up(hidden, 128)             # lane-pad hidden/output features
    op = _round_up(out_dim, 128)

    def padw(a, rows, cols, dt):
        a = a.astype(f32)
        return jnp.pad(a, ((0, rows - a.shape[0]),
                           (0, cols - a.shape[1]))).astype(dt)

    # Weights are matmul operands (bf16 when enabled halves weight DMA + VMEM);
    # biases stay f32 so the epilogue runs in f32 (v5e has no bf16 VALU).
    w1p, b1p = padw(w1, d, hp, compute_dtype), padw(b1, 1, hp, f32)
    w2p, b2p = padw(w2, hp, hp, compute_dtype), padw(b2, 1, hp, f32)
    w3p, b3p = padw(w3, hp, op, compute_dtype), padw(b3, 1, op, f32)
    x1 = x1.astype(f32)
    x2 = x2.astype(f32)

    w_bytes = ew * (d * hp + hp * hp + hp * op) + 4 * (2 * hp + op)

    def vmem_limit(block_bytes):
        # blocks are double-buffered by default; clamp within [32, 64] MiB so
        # the value is valid on every chip generation.
        return int(min(64 * 2**20, max(32 * 2**20, 2 * block_bytes + (4 << 20))))

    def mlp_call(x):
        n = x.shape[0]
        tm = _pick_tile(n, row_tile)
        blk = 4 * tm * d + 4 * tm * hp + w_bytes + ez * tm * op
        return pl.pallas_call(
            functools.partial(_mlp_kernel, compute_dtype=compute_dtype,
                              precision=precision),
            out_shape=jax.ShapeDtypeStruct((n, op), z_dtype),
            grid_spec=pltpu.PrefetchScalarGridSpec(
                num_scalar_prefetch=0,
                grid=(pl.cdiv(n, tm),),
                in_specs=[
                    pl.BlockSpec((tm, d), lambda i: (i, 0)),    # x row tile
                    pl.BlockSpec((d, hp), lambda i: (0, 0)),    # w1 (resident)
                    pl.BlockSpec((1, hp), lambda i: (0, 0)),    # b1
                    pl.BlockSpec((hp, hp), lambda i: (0, 0)),   # w2
                    pl.BlockSpec((1, hp), lambda i: (0, 0)),    # b2
                    pl.BlockSpec((hp, op), lambda i: (0, 0)),   # w3
                    pl.BlockSpec((1, op), lambda i: (0, 0)),    # b3
                ],
                out_specs=pl.BlockSpec((tm, op), lambda i: (i, 0)),
            ),
            compiler_params=pltpu.CompilerParams(
                dimension_semantics=("parallel",),
                vmem_limit_bytes=vmem_limit(blk)),
            cost_estimate=pl.CostEstimate(
                flops=2 * n * (d * hp + hp * hp + hp * op),
                transcendentals=0,
                bytes_accessed=4 * n * d + w_bytes + ez * n * op),
        )(x, w1p, b1p, w2p, b2p, w3p, b3p)

    if diag:
        # torch.diag(z1 @ z2.T): row-wise reduce over the first min(n1,n2)
        # rows; skips the O(n1*n2) Gram matmul and its HBM write entirely.
        k = min(n1, n2)
        z1 = mlp_call(x1[:k])
        z2 = mlp_call(x2[:k])
        return jnp.sum(z1.astype(f32) * z2.astype(f32), axis=-1)

    # Stage 1: embeddings for x2 only (x1's embeddings never hit HBM when the
    # fused path below applies).
    z2 = mlp_call(x2)                      # (n2, op) in z_dtype

    tm1 = _pick_tile(n1, row_tile)
    fused_blk = (ez * n2 * op              # resident z2 block
                 + 4 * tm1 * n2            # f32 output tile
                 + 4 * tm1 * d + 4 * tm1 * hp + w_bytes)

    if not force_two_stage and fused_blk <= fuse_vmem_budget:
        return pl.pallas_call(
            functools.partial(_fused_kernel, compute_dtype=compute_dtype,
                              precision=precision),
            out_shape=jax.ShapeDtypeStruct((n1, n2), f32),
            grid_spec=pltpu.PrefetchScalarGridSpec(
                num_scalar_prefetch=0,
                grid=(pl.cdiv(n1, tm1),),
                in_specs=[
                    pl.BlockSpec((tm1, d), lambda i: (i, 0)),   # x1 row tile
                    pl.BlockSpec((d, hp), lambda i: (0, 0)),
                    pl.BlockSpec((1, hp), lambda i: (0, 0)),
                    pl.BlockSpec((hp, hp), lambda i: (0, 0)),
                    pl.BlockSpec((1, hp), lambda i: (0, 0)),
                    pl.BlockSpec((hp, op), lambda i: (0, 0)),
                    pl.BlockSpec((1, op), lambda i: (0, 0)),
                    pl.BlockSpec((n2, op), lambda i: (0, 0)),   # z2 (resident)
                ],
                out_specs=pl.BlockSpec((tm1, n2), lambda i: (i, 0)),
            ),
            compiler_params=pltpu.CompilerParams(
                dimension_semantics=("parallel",),
                vmem_limit_bytes=vmem_limit(fused_blk)),
            cost_estimate=pl.CostEstimate(
                flops=2 * n1 * (d * hp + hp * hp + hp * op) + 2 * n1 * n2 * op,
                transcendentals=0,
                bytes_accessed=4 * n1 * d + w_bytes + ez * n2 * op + 4 * n1 * n2),
        )(x1, w1p, b1p, w2p, b2p, w3p, b3p, z2)

    # Fallback two-stage path (z2 too large to keep resident): materialize z1
    # and run a tiled Gram kernel.  z1's block index is constant across j so
    # the tile stays revisited while wide, lane-dense N tiles stream.
    z1 = mlp_call(x1)
    tm = _pick_tile(n1, row_tile)
    tn = _pick_tile(n2, gram_tile_n)
    gi, gj = pl.cdiv(n1, tm), pl.cdiv(n2, tn)
    gram_blk = ez * (tm + tn) * op + 4 * tm * tn
    return pl.pallas_call(
        functools.partial(_gram_kernel, precision=precision),
        out_shape=jax.ShapeDtypeStruct((n1, n2), f32),
        grid_spec=pltpu.PrefetchScalarGridSpec(
            num_scalar_prefetch=0,
            grid=(gi, gj),
            in_specs=[
                pl.BlockSpec((tm, op), lambda i, j: (i, 0)),    # z1 tile
                pl.BlockSpec((tn, op), lambda i, j: (j, 0)),    # z2 tile
            ],
            out_specs=pl.BlockSpec((tm, tn), lambda i, j: (i, j)),
        ),
        compiler_params=pltpu.CompilerParams(
            dimension_semantics=("parallel", "parallel"),
            vmem_limit_bytes=vmem_limit(gram_blk)),
        cost_estimate=pl.CostEstimate(
            flops=2 * n1 * n2 * op,
            transcendentals=0,
            bytes_accessed=ez * (n1 * op + gi * n2 * op) + 4 * n1 * n2),
    )(z1, z2)


# --------------------------------------------------------------------------
# Parameter init (matches nn.Linear shapes; weights stored as (in, out) so the
# kernel computes x @ W + b, equivalent to PyTorch's x @ W_pt.T + b).
# --------------------------------------------------------------------------
def init_params(key, input_dim, hidden_dim, output_dim):
    ks = jax.random.split(key, 6)
    s1 = 1.0 / jnp.sqrt(input_dim)
    s2 = 1.0 / jnp.sqrt(hidden_dim)
    w1 = jax.random.uniform(ks[0], (input_dim, hidden_dim), jnp.float32, -s1, s1)
    b1 = jax.random.uniform(ks[1], (1, hidden_dim), jnp.float32, -s1, s1)
    w2 = jax.random.uniform(ks[2], (hidden_dim, hidden_dim), jnp.float32, -s2, s2)
    b2 = jax.random.uniform(ks[3], (1, hidden_dim), jnp.float32, -s2, s2)
    w3 = jax.random.uniform(ks[4], (hidden_dim, output_dim), jnp.float32, -s2, s2)
    b3 = jax.random.uniform(ks[5], (1, output_dim), jnp.float32, -s2, s2)
    return (w1, b1, w2, b2, w3, b3)


def reference(x1, x2, params):
    """Pure-JAX reference matching NNKernel.forward (num_layers=2), f32."""
    w1, b1, w2, b2, w3, b3 = params
    hi = lax.Precision.HIGHEST

    def mlp(x):
        h = jnp.maximum(jnp.dot(x, w1, precision=hi) + b1, 0.0)
        h = jnp.maximum(jnp.dot(h, w2, precision=hi) + b2, 0.0)
        return jnp.dot(h, w3, precision=hi) + b3

    return jnp.dot(mlp(x1), mlp(x2).T, precision=hi)


if __name__ == "__main__":
    # Shapes consistent with the module: x1 (n1, input_dim), x2 (n2, input_dim).
    # TODO(synk): kernel hard-codes the num_layers=2 MLP structure (the tested
    # config); variable-depth MLPs would need a params list + generated specs.
    # TODO(synk): last_dim_is_batch=True raises NotImplementedError in the
    # reference module and is not implemented here either.
    input_dim, hidden_dim, output_dim = 16, 32, 8
    n1, n2 = 8, 8

    key = jax.random.PRNGKey(0)
    kx1, kx2, kp = jax.random.split(key, 3)
    x1 = jax.random.normal(kx1, (n1, input_dim), jnp.float32)
    x2 = jax.random.normal(kx2, (n2, input_dim), jnp.float32)
    params = init_params(kp, input_dim, hidden_dim, output_dim)

    ref = reference(x1, x2, params)

    # 1) Default path: bf16 MXU operands, fused (z1 never hits HBM).
    out = jax.block_until_ready(nn_kernel(x1, x2, params))
    assert out.shape == (n1, n2)
    assert jnp.allclose(out, ref, atol=5e-2, rtol=5e-2), "bf16 fused mismatch"

    # 2) Exact f32 path, fused.
    out_f32 = jax.block_until_ready(nn_kernel(x1, x2, params, use_bf16=False))
    assert jnp.allclose(out_f32, ref, atol=1e-5, rtol=1e-5), "f32 fused mismatch"

    # 3) Exact f32 path, two-stage (exercises the tiled Gram kernel).
    out_2s = jax.block_until_ready(
        nn_kernel(x1, x2, params, use_bf16=False, force_two_stage=True))
    assert jnp.allclose(out_2s, ref, atol=1e-5, rtol=1e-5), "two-stage mismatch"

    # 4) Diagonal path (default bf16).
    dg = jax.block_until_ready(nn_kernel(x1, x2, params, diag=True))
    assert dg.shape == (n1,)
    assert jnp.allclose(dg, jnp.diagonal(ref), atol=5e-2, rtol=5e-2), "diag mismatch"

    print("KERNEL_OK")
</pallas_src>

<mosaic_0001>
module attributes {stable_mosaic.version = 11 : i64} {
  func.func @_mlp_kernel(%arg0: i32, %arg1: memref<8x16xf32, #tpu.memory_space<vmem>>, %arg2: memref<16x128xbf16, #tpu.memory_space<vmem>>, %arg3: memref<1x128xf32, #tpu.memory_space<vmem>>, %arg4: memref<128x128xbf16, #tpu.memory_space<vmem>>, %arg5: memref<1x128xf32, #tpu.memory_space<vmem>>, %arg6: memref<128x128xbf16, #tpu.memory_space<vmem>>, %arg7: memref<1x128xf32, #tpu.memory_space<vmem>>, %arg8: memref<8x128xbf16, #tpu.memory_space<vmem>>) attributes {dimension_semantics = [#tpu.dimension_semantics<parallel>], iteration_bounds = array<i64: 1>, scalar_prefetch = 0 : i64, scratch_operands = 0 : i64, tpu.core_type = #tpu.core_type<tc>, window_params = [{transform_indices = @transform_0, window_bounds = array<i64: 8, 16>}, {pipeline_mode = #tpu.pipeline_mode<synchronous>, transform_indices = @transform_1, window_bounds = array<i64: 16, 128>}, {pipeline_mode = #tpu.pipeline_mode<synchronous>, transform_indices = @transform_2, window_bounds = array<i64: 1, 128>}, {pipeline_mode = #tpu.pipeline_mode<synchronous>, transform_indices = @transform_3, window_bounds = array<i64: 128, 128>}, {pipeline_mode = #tpu.pipeline_mode<synchronous>, transform_indices = @transform_4, window_bounds = array<i64: 1, 128>}, {pipeline_mode = #tpu.pipeline_mode<synchronous>, transform_indices = @transform_5, window_bounds = array<i64: 128, 128>}, {pipeline_mode = #tpu.pipeline_mode<synchronous>, transform_indices = @transform_6, window_bounds = array<i64: 1, 128>}, {transform_indices = @transform_7, window_bounds = array<i64: 8, 128>}]} {
    %c0 = arith.constant 0 : index
    %c0_0 = arith.constant 0 : index
    %0 = vector.load %arg1[%c0, %c0_0] : memref<8x16xf32, #tpu.memory_space<vmem>>, vector<8x16xf32>
    %c0_1 = arith.constant 0 : index
    %c0_2 = arith.constant 0 : index
    %1 = vector.load %arg2[%c0_1, %c0_2] : memref<16x128xbf16, #tpu.memory_space<vmem>>, vector<16x128xbf16>
    %c0_3 = arith.constant 0 : index
    %c0_4 = arith.constant 0 : index
    %2 = vector.load %arg3[%c0_3, %c0_4] : memref<1x128xf32, #tpu.memory_space<vmem>>, vector<1x128xf32>
    %c0_5 = arith.constant 0 : index
    %c0_6 = arith.constant 0 : index
    %3 = vector.load %arg4[%c0_5, %c0_6] : memref<128x128xbf16, #tpu.memory_space<vmem>>, vector<128x128xbf16>
    %c0_7 = arith.constant 0 : index
    %c0_8 = arith.constant 0 : index
    %4 = vector.load %arg5[%c0_7, %c0_8] : memref<1x128xf32, #tpu.memory_space<vmem>>, vector<1x128xf32>
    %c0_9 = arith.constant 0 : index
    %c0_10 = arith.constant 0 : index
    %5 = vector.load %arg6[%c0_9, %c0_10] : memref<128x128xbf16, #tpu.memory_space<vmem>>, vector<128x128xbf16>
    %c0_11 = arith.constant 0 : index
    %c0_12 = arith.constant 0 : index
    %6 = vector.load %arg7[%c0_11, %c0_12] : memref<1x128xf32, #tpu.memory_space<vmem>>, vector<1x128xf32>
    %7 = arith.truncf %0 : vector<8x16xf32> to vector<8x16xbf16>
    %cst = arith.constant dense<0.000000e+00> : vector<8x128xf32>
    %8 = tpu.matmul %7, %1, %cst {dimension_numbers = #tpu.dot_dimension_numbers<[1], [0], [0], [1], [0, 0, 1, 1], [], []>} : vector<8x16xbf16>, vector<16x128xbf16>, vector<8x128xf32> -> vector<8x128xf32>
    %9 = vector.broadcast %2 : vector<1x128xf32> to vector<8x128xf32>
    %10 = arith.addf %8, %9 : vector<8x128xf32>
    %cst_13 = arith.constant 0.000000e+00 : f32
    %11 = vector.broadcast %cst_13 : f32 to vector<8x128xf32>
    %12 = arith.maximumf %10, %11 : vector<8x128xf32>
    %13 = arith.truncf %12 : vector<8x128xf32> to vector<8x128xbf16>
    %cst_14 = arith.constant dense<0.000000e+00> : vector<8x128xf32>
    %14 = tpu.matmul %13, %3, %cst_14 {dimension_numbers = #tpu.dot_dimension_numbers<[1], [0], [0], [1], [0, 0, 1, 1], [], []>} : vector<8x128xbf16>, vector<128x128xbf16>, vector<8x128xf32> -> vector<8x128xf32>
    %15 = vector.broadcast %4 : vector<1x128xf32> to vector<8x128xf32>
    %16 = arith.addf %14, %15 : vector<8x128xf32>
    %cst_15 = arith.constant 0.000000e+00 : f32
    %17 = vector.broadcast %cst_15 : f32 to vector<8x128xf32>
    %18 = arith.maximumf %16, %17 : vector<8x128xf32>
    %19 = arith.truncf %18 : vector<8x128xf32> to vector<8x128xbf16>
    %cst_16 = arith.constant dense<0.000000e+00> : vector<8x128xf32>
    %20 = tpu.matmul %19, %5, %cst_16 {dimension_numbers = #tpu.dot_dimension_numbers<[1], [0], [0], [1], [0, 0, 1, 1], [], []>} : vector<8x128xbf16>, vector<128x128xbf16>, vector<8x128xf32> -> vector<8x128xf32>
    %21 = vector.broadcast %6 : vector<1x128xf32> to vector<8x128xf32>
    %22 = arith.addf %20, %21 : vector<8x128xf32>
    %23 = arith.truncf %22 : vector<8x128xf32> to vector<8x128xbf16>
    %c0_17 = arith.constant 0 : index
    %c0_18 = arith.constant 0 : index
    %24 = vector.load %arg8[%c0_17, %c0_18] : memref<8x128xbf16, #tpu.memory_space<vmem>>, vector<8x128xbf16>
    tpu.vector_store %arg8[%c0_17, %c0_18], %23 {strides = array<i32>} : memref<8x128xbf16, #tpu.memory_space<vmem>>, vector<8x128xbf16>,
    return
  }
  func.func @transform_0(%arg0: i32) -> (i32, i32) {
    %c0_i32 = arith.constant 0 : i32
    %c0_i32_0 = arith.constant 0 : i32
    return %arg0, %c0_i32 : i32, i32
  }
  func.func @transform_1(%arg0: i32) -> (i32, i32) {
    %c0_i32 = arith.constant 0 : i32
    %c0_i32_0 = arith.constant 0 : i32
    %c0_i32_1 = arith.constant 0 : i32
    return %c0_i32, %c0_i32_0 : i32, i32
  }
  func.func @transform_2(%arg0: i32) -> (i32, i32) {
    %c0_i32 = arith.constant 0 : i32
    %c0_i32_0 = arith.constant 0 : i32
    %c0_i32_1 = arith.constant 0 : i32
    return %c0_i32, %c0_i32_0 : i32, i32
  }
  func.func @transform_3(%arg0: i32) -> (i32, i32) {
    %c0_i32 = arith.constant 0 : i32
    %c0_i32_0 = arith.constant 0 : i32
    %c0_i32_1 = arith.constant 0 : i32
    return %c0_i32, %c0_i32_0 : i32, i32
  }
  func.func @transform_4(%arg0: i32) -> (i32, i32) {
    %c0_i32 = arith.constant 0 : i32
    %c0_i32_0 = arith.constant 0 : i32
    %c0_i32_1 = arith.constant 0 : i32
    return %c0_i32, %c0_i32_0 : i32, i32
  }
  func.func @transform_5(%arg0: i32) -> (i32, i32) {
    %c0_i32 = arith.constant 0 : i32
    %c0_i32_0 = arith.constant 0 : i32
    %c0_i32_1 = arith.constant 0 : i32
    return %c0_i32, %c0_i32_0 : i32, i32
  }
  func.func @transform_6(%arg0: i32) -> (i32, i32) {
    %c0_i32 = arith.constant 0 : i32
    %c0_i32_0 = arith.constant 0 : i32
    %c0_i32_1 = arith.constant 0 : i32
    return %c0_i32, %c0_i32_0 : i32, i32
  }
  func.func @transform_7(%arg0: i32) -> (i32, i32) {
    %c0_i32 = arith.constant 0 : i32
    %c0_i32_0 = arith.constant 0 : i32
    return %arg0, %c0_i32 : i32, i32
  }
}

</mosaic_0001>

<bundles_post_ra>
// kernel: tpu_custom_call.1
= control target key start
LH: loop header
LB: loop body
LE: loop exit
PB: predicated region body
PF: predicated region fallthrough
CT: control target
= control target key end

     0   :  { %12 = vsyncpa [#allocation3], 0  ;;  %s602_s0 = inlined_call_operand.hbm [shape: f32[8,16], index: 0, kind: input, shape index: {}]   ;;  %s603_s1 = inlined_call_operand.hbm [shape: bf16[16,128], index: 1, kind: input, shape index: {}]   ;;  %s604_s2 = inlined_call_operand.vmem [shape: f32[1,128], index: 2, kind: input, shape index: {}]   ;;  %s605_s3 = inlined_call_operand.hbm [shape: bf16[128,128], index: 3, kind: input, shape index: {}]   ;;  %s606_s4 = inlined_call_operand.vmem [shape: f32[1,128], index: 4, kind: input, shape index: {}]   ;;  %s607_s5 = inlined_call_operand.hbm [shape: bf16[128,128], index: 5, kind: input, shape index: {}]   ;;  %s608_s6 = inlined_call_operand.vmem [shape: f32[1,128], index: 6, kind: input, shape index: {}]   ;;  %s609_s7 = inlined_call_operand.hbm [shape: bf16[8,128], index: 7, kind: output, shape index: {}]  }
   0x1   :  { %13 = vsyncpa [#allocation6], 0 }
   0x2   :  { %14 = vsyncpa [#allocation9], 0  ;;  %s31_s26 = sshll.u32 %s603_s1, 4  ;;  %s32_s26 = int_to_ptr.hbm [resolvable:$true] %s31_s26 }
   0x3   :  { %15 = vsyncpa [#allocation4], 0  ;;  %s531_s27 = smov [#allocation5]   ;;  %s21_s8 = sshll.u32 %s602_s0, 4  ;;  %s22_s8 = int_to_ptr.hbm [resolvable:$true] %s21_s8 }
   0x4   :  { %s33_s28 = sshll.u32 %s531_s27, 4  ;;  %s532_s9 = smov 64   ;;  %s34_s28 = int_to_ptr.vmem [resolvable:$true] %s33_s28 }
   0x5   :  { %s533_s10 = smov 4   ;;  %s534_s11 = smov [#allocation2]  }
   0x6   :  { %39 = dma.hbm_to_vmem [thread:$0]  %s32_s26, 128, %s34_s28, [#allocation6], %s532_s9, %s532_s9, %s533_s10  }
   0x7   :  { %s23_s12 = sshll.u32 %s534_s11, 4  ;;  %s46_s15 = sshll.u32 %s605_s3, 4  ;;  %s24_s12 = int_to_ptr.vmem [resolvable:$true] %s23_s12  ;;  %s47_s15 = int_to_ptr.hbm [resolvable:$true] %s46_s15 }
   0x8   :  { %26 = dma.hbm_to_vmem [thread:$0]  %s22_s8, 128, %s24_s12, [#allocation3]  }
   0x9   :  { %s61_s17 = sshll.u32 %s607_s5, 4  ;;  %s535_s18 = smov [#allocation7]   ;;  %s62_s17 = int_to_ptr.hbm [resolvable:$true] %s61_s17 }
   0xa   :  { %s48_s19 = sshll.u32 %s535_s18, 4  ;;  %s536_s0 = smov [#allocation8]   ;;  %s49_s19 = int_to_ptr.vmem [resolvable:$true] %s48_s19 }
   0xb   :  { %54 = dma.hbm_to_vmem [thread:$0]  %s47_s15, 1024, %s49_s19, [#allocation6], %s532_s9, %s532_s9, %s533_s10  }
   0xc   :  { %s63_s20 = sshll.u32 %s536_s0, 4  ;;  %s64_s20 = int_to_ptr.vmem [resolvable:$true] %s63_s20 }
   0xd   :  { %69 = dma.hbm_to_vmem [thread:$0]  %s62_s17, 1024, %s64_s20, [#allocation9], %s532_s9, %s532_s9, %s533_s10  }
   0xe   :  { %523 = dma.done.wait [#allocation3], 128  }
   0xf   :  { %524 = vsyncadd [#allocation3], 4294967168 }
  0x10   :  { %525 = dma.done.wait [#allocation6], 1152  }
  0x11   :  { %526 = vsyncadd [#allocation6], 4294966144 }
  0x12   :  { %527 = dma.done.wait [#allocation9], 1024  }
  0x13   :  { %528 = vsyncadd [#allocation9], 4294966272  ;;  %v376_v0 = vld [vmem:[#allocation5] sm:$0xff]  ;;  %v89_v1 = vld [vmem:[#allocation2] sm:$0xff]  ;;  %vm137_vm0 = vcmask 130048   ;;  %s537_s24 = smov [#allocation10]  }
  0x14   :  { %v384_v2 = vld [vmem:[#allocation7 + $0x38] sm:$0xff]  ;;  %v127_v3 = vpack.c.bf16 %v89_v1, %v89_v1  ;;  %148 = vmatpush.bf16.msra.mxu0 %v376_v0  ;;  %v383_v4 = vld [vmem:[#allocation7 + $0x30] sm:$0xff]  ;;  %v382_v5 = vld [vmem:[#allocation7 + $0x28] sm:$0xff]  ;;  %s293_s25 = sshll.u32 %s537_s24, 4  ;;  %s295_s28 = sshll.u32 %s609_s7, 4  ;;  %s294_s25 = int_to_ptr.vmem [resolvable:$true] %s293_s25  ;;  %s296_s28 = int_to_ptr.hbm [resolvable:$true] %s295_s28 }
  0x15   :  { %207 = vmatpush.bf16.msra.mxu1 %v384_v2  ;;  %v381_v6 = vld [vmem:[#allocation7 + $0x20] sm:$0xff]  ;;  %v380_v7 = vld [vmem:[#allocation7 + $0x18] sm:$0xff]  ;;  %v379_v8 = vld [vmem:[#allocation7 + $0x10] sm:$0xff] }
  0x16   :  { %v378_v9 = vld [vmem:[#allocation7 + $0x8] sm:$0xff]  ;;  %v377_v10 = vld [vmem:[#allocation7] sm:$0xff]  ;;  %v392_v11 = vld [vmem:[#allocation8 + $0x38] sm:$0xff] }
  0x17   :  { %311 = vmatmul.msk.bf16.vlgmr.msra.gmra.mxu0 %vm137_vm0, %v127_v3  ;;  %273 = vmatpush.bf16.msra.mxu2 %v392_v11  ;;  %v391_v12 = vld [vmem:[#allocation8 + $0x30] sm:$0xff]  ;;  %v390_v13 = vld [vmem:[#allocation8 + $0x28] sm:$0xff]  ;;  %v389_v14 = vld [vmem:[#allocation8 + $0x20] sm:$0xff] }
  0x18   :  { %v388_v15 = vld [vmem:[#allocation8 + $0x18] sm:$0xff]  ;;  %v387_v16 = vld [vmem:[#allocation8 + $0x10] sm:$0xff]  ;;  %v386_v23 = vld [vmem:[#allocation8 + $0x8] sm:$0xff] }
  0x19   :  { %208 = vmatpush.bf16.msra.mxu1 %v383_v4  ;;  %v400_v17 = vld [vmem:[%s604_s2] ss:$0 sm:$0xff]  ;;  %v385_v24 = vld [vmem:[#allocation8] sm:$0xff] }
  0x1a   :  { %v401_v25 = vld [vmem:[%s606_s4] ss:$0 sm:$0xff] }
  0x1b   :  { %274 = vmatpush.bf16.msra.mxu2 %v391_v12  ;;  %v402_v31 = vld [vmem:[%s608_s6] ss:$0 sm:$0xff] }
  0x1d   :  { %209 = vmatpush.bf16.msra.mxu1 %v382_v5 }
  0x1f   :  { %275 = vmatpush.bf16.msra.mxu2 %v390_v13 }
  0x21   :  { %210 = vmatpush.bf16.msra.mxu1 %v381_v6 }
  0x23   :  { %276 = vmatpush.bf16.msra.mxu2 %v389_v14 }
  0x25   :  { %211 = vmatpush.bf16.msra.mxu1 %v380_v7 }
  0x27   :  { %277 = vmatpush.bf16.msra.mxu2 %v388_v15 }
  0x29   :  { %212 = vmatpush.bf16.msra.mxu1 %v379_v8 }
  0x2b   :  { %278 = vmatpush.bf16.msra.mxu2 %v387_v16 }
  0x2d   :  { %213 = vmatpush.bf16.msra.mxu1 %v378_v9 }
  0x2f   :  { %279 = vmatpush.bf16.msra.mxu2 %v386_v23 }
  0x31   :  { %214 = vmatpush.bf16.msra.mxu1 %v377_v10 }
  0x33   :  { %280 = vmatpush.bf16.msra.mxu2 %v385_v24 }
  0x94   :  { %v150_v18 = vpop.f32.mrf.mxu0 }
  0x95   :  { %v151_v19 = vadd.f32 %v400_v17, %v150_v18 }
  0x97   :  { %v154_v20 = vmax.f32 %v151_v19, 0.0 }
  0x99   :  { %v155_v21 = vpack.c.bf16 %v154_v20, %v154_v20 }
  0x9b   :  { %215 = vmatmul.bf16.vlgmr.msra.gmra.mxu1 %v155_v21 }
  0x9c   :  { %v152_v22 = vpop.f32.mrf.mxu0 }
 0x118   :  { %v216_v26 = vpop.f32.mrf.mxu1 }
 0x119   :  { %v217_v27 = vadd.f32 %v401_v25, %v216_v26 }
 0x11b   :  { %v220_v28 = vmax.f32 %v217_v27, 0.0 }
 0x11d   :  { %v221_v29 = vpack.c.bf16 %v220_v28, %v220_v28 }
 0x11f   :  { %281 = vmatmul.bf16.vlgmr.msra.gmra.mxu2 %v221_v29 }
 0x120   :  { %v218_v30 = vpop.f32.mrf.mxu1 }
 0x1a2   :  { %v282_v32 = vpop.f32.mrf.mxu2 }
 0x1a3   :  { %v283_v33 = vadd.f32 %v402_v31, %v282_v32 }
 0x1a5   :  { %v286_v34 = vpack.c.bf16 %v283_v33, %v283_v33 }
 0x1a7   :  { %287 = vst [vmem:[#allocation10] sm:$0xf] %v286_v34 }
 0x1a8   :  { %298 = dma.vmem_to_hbm [thread:$0]  %s294_s25, 64, %s296_s28, [#allocation4]  }
 0x1aa   :  { %v284_v35 = vpop.f32.mrf.mxu2 }
 0x1ab   :  { %529 = dma.done.wait [#allocation4], 64  }
 0x1ac   :  { %530 = vsyncadd [#allocation4], 4294967232 }
 0x1ad   :  { %303 = vsyncpa [#allocation3], 1 }
 0x1ae   :  { %304 = vsyncpa [#allocation6], 1 }
 0x1af   :  { %305 = vsyncpa [#allocation9], 1 }
 0x1b0   :  { %306 = vsyncpa [#allocation4], 1 }

</bundles_post_ra>
